<compile_context>
chip_gen: v7x
topology: tpu7x:2x2x1
jax: 0.10.0
libtpu: 0.0.40
codegen_flags: <defaults>
</compile_context>

<pallas_src>
import functools

import jax
import jax.numpy as jnp
from jax import lax
from jax.experimental import pallas as pl
from jax.experimental.pallas import tpu as pltpu


def _round_up(n, m):
    return ((n + m - 1) // m) * m


def _pad_axis(a, axis, target):
    pad = target - a.shape[axis]
    if pad == 0:
        return a
    widths = [(0, 0)] * a.ndim
    widths[axis] = (0, pad)
    return jnp.pad(a, widths)


def _device_kind():
    try:
        return jax.devices()[0].device_kind.lower()
    except Exception:
        return ""


# ----------------------------------------------------------------------------
# Phase 1: hoisted input projection  xW = x @ W_ih^T + (b_ih + b_hh)
# Parallel over time tiles; no recurrence here, full MXU efficiency.
# ----------------------------------------------------------------------------
def _input_proj_kernel(x_ref, w_ref, b_ref, o_ref):
    tb, bp, ip = x_ref.shape
    x2 = x_ref[...].reshape(tb * bp, ip)                 # bf16 (Tb*Bp, Ip)
    y = jnp.dot(x2, w_ref[...], preferred_element_type=jnp.float32) + b_ref[...]
    o_ref[...] = y.reshape(tb, bp, -1).astype(o_ref.dtype)


# ----------------------------------------------------------------------------
# Phase 2: LSTM recurrence + per-time-tile fc head.
# ----------------------------------------------------------------------------
def _lstm_kernel(
    xw_ref,    # (Tb, Bt, 4Hp) bf16  precomputed x-projection (+ fused bias)
    h0_ref,    # (1, Bt, Hp) f32     initial hidden state
    c0_ref,    # (1, Bt, Hp) f32     initial cell state
    whh_ref,   # (Hp, 4Hp) bf16      hidden->gates weights (pre-transposed)
    wfc_ref,   # (Hp, Op) bf16       fc weights (pre-transposed)
    bfc_ref,   # (1, Op) f32         fc bias
    fc_ref,    # out (Tb, Bt, Op) f32
    hN_ref,    # out (1, Bt, Hp)     final hidden (written on last time tile)
    cN_ref,    # out (1, Bt, Hp)     final cell   (written on last time tile)
    h_scr,     # VMEM (Bt, Hp) f32 — carries h across time tiles
    c_scr,     # VMEM (Bt, Hp) f32 — carries c across time tiles
    hblk_scr,  # VMEM (Tb, Bt, Hp) f32 — hidden states of this tile (for fc)
    *,
    hidden_p,
    t_block,
    t_total,
    mask_tail,
    unroll,
):
    # NOTE: the h/c scratch carry requires the time axis to be the innermost
    # ("arbitrary") grid axis with re-init at t == 0 for each batch tile.
    # Do NOT reorder the grid.
    t = pl.program_id(1)
    Hp = hidden_p

    @pl.when(t == 0)
    def _():
        h_scr[...] = h0_ref[0].astype(jnp.float32)
        c_scr[...] = c0_ref[0].astype(jnp.float32)

    def step(s, carry):
        h_prev, c_prev = carry
        # gates = xW[t] + h_prev @ W_hh^T  (bias already fused into xW).
        # bf16 operands through the MXU, f32 accumulation; gate math in f32.
        gates = xw_ref[s].astype(jnp.float32) + jnp.dot(
            h_prev.astype(jnp.bfloat16), whh_ref[...],
            preferred_element_type=jnp.float32)
        # PyTorch gate ordering: i, f, g, o (Hp-aligned, lane-aligned slices)
        i_g = jax.nn.sigmoid(gates[:, 0 * Hp:1 * Hp])
        f_g = jax.nn.sigmoid(gates[:, 1 * Hp:2 * Hp])
        g_g = jnp.tanh(gates[:, 2 * Hp:3 * Hp])
        o_g = jax.nn.sigmoid(gates[:, 3 * Hp:4 * Hp])
        c_new = f_g * c_prev + i_g * g_g
        h_new = o_g * jnp.tanh(c_new)
        if mask_tail:
            # padded time steps (beyond the real sequence) hold h/c constant
            valid = (t * t_block + s) < t_total
            c_new = jnp.where(valid, c_new, c_prev)
            h_new = jnp.where(valid, h_new, h_prev)
        hblk_scr[s] = h_new
        return (h_new, c_new)

    # TODO(synk): interleave two independent half-batch recurrences here for
    # extra ILP across the MXU->VPU->EUP chain when Bt >= 16.
    h_fin, c_fin = lax.fori_loop(0, t_block, step,
                                 (h_scr[...], c_scr[...]), unroll=unroll)
    h_scr[...] = h_fin
    c_scr[...] = c_fin

    # nn.Dropout is identity in eval mode.
    # TODO(synk): training-mode dropout (p=0.5) would need pltpu.prng_* masking.

    # fc head batched over the whole time tile: (Tb*Bt, Hp) @ (Hp, Op)
    tb_, bt_, hp_ = hblk_scr.shape
    h_all = hblk_scr[...].reshape(tb_ * bt_, hp_).astype(jnp.bfloat16)
    fc = jnp.dot(h_all, wfc_ref[...],
                 preferred_element_type=jnp.float32) + bfc_ref[...]
    fc_ref[...] = fc.reshape(tb_, bt_, -1).astype(fc_ref.dtype)

    # Final states only need the last value — write once.
    @pl.when(t == pl.num_programs(1) - 1)
    def _():
        hN_ref[0] = h_fin.astype(hN_ref.dtype)
        cN_ref[0] = c_fin.astype(cN_ref.dtype)


# ----------------------------------------------------------------------------
# Time-tile selection from a per-generation VMEM budget.
# ----------------------------------------------------------------------------
def _pick_time_tile(T, Bp, Bt, Hp, Op, Ip, budget):
    w2 = (Hp * 4 * Hp * 2) + (Hp * Op * 2) + (Op * 4) + 4 * (Bt * Hp * 4)
    w1 = (Ip * 4 * Hp * 2) + (4 * Hp * 4)

    def live(tb):
        p2 = (2 * (tb * Bt * 4 * Hp * 2)      # xw in (bf16), double-buffered
              + 2 * (tb * Bt * Op * 4)        # fc out (f32), double-buffered
              + tb * Bt * Hp * 4              # hblk scratch
              + 2 * Bt * Hp * 4               # h/c scratch
              + 4 * (Bt * Hp * 4)             # hN/cN outs, double-buffered
              + w2)
        p1 = (2 * (tb * Bp * Ip * 2)          # x in (bf16), double-buffered
              + 2 * (tb * Bp * 4 * Hp * 2)    # xw out (bf16), double-buffered
              + w1)
        return max(p1, p2)

    for cand in (128, 64, 32, 16, 8, 4, 2, 1):
        tb = max(1, min(cand, T))
        if live(tb) <= budget:
            return tb
    return 1


# ----------------------------------------------------------------------------
# Wrapper: padding/alignment, generation-aware sizing, weight prep, the two
# pallas_calls.
# ----------------------------------------------------------------------------
def charrnn_forward(x, hidden, params):
    """x: (B, T, I) batch_first; hidden: (h0, c0) each (1, B, H).

    Returns (out, (h_n, c_n)) with out: (B*T, O) — matching the PyTorch module.
    """
    h0, c0 = hidden
    B, T, I = x.shape
    H = params["w_hh"].shape[1]
    O = params["w_fc"].shape[0]

    # ---- generation-aware budget --------------------------------------------
    kind = _device_kind()
    is_v7 = "v7" in kind
    if is_v7:
        vmem_budget = 48 * 1024 * 1024       # 64 MiB physical VMEM per TC
    elif ("v5" in kind) or ("v6" in kind):
        vmem_budget = 96 * 1024 * 1024       # 128 MiB physical VMEM
    else:
        vmem_budget = 48 * 1024 * 1024       # conservative default

    # ---- aligned sizes -------------------------------------------------------
    Bp = _round_up(B, 8)       # sublane multiple
    Hp = _round_up(H, 128)     # lane multiple -> free gate slicing
    Op = _round_up(O, 128)     # lane-dense fc output stores
    Ip = _round_up(I, 128)

    # batch tile: only split across cores on 2-TensorCore chips (v7x), and
    # only when each core keeps a healthy MXU M dimension (>= 64 rows).
    if is_v7 and Bp >= 128 and (Bp // 2) % 8 == 0:
        Bt = Bp // 2
    else:
        Bt = Bp
    nB = Bp // Bt

    # time tile from the VMEM budget; pad T to a multiple of Tb and mask.
    Tb = _pick_time_tile(T, Bp, Bt, Hp, Op, Ip, vmem_budget)
    Tp = _round_up(T, Tb)
    nT = Tp // Tb
    mask_tail = (Tp != T)

    # ---- weight prep (per-gate padding of the 4H axis, bf16 MXU operands) ----
    def pad_gate_mat(w, k_pad):                 # (4H, K) -> (4*Hp, k_pad)
        w4 = w.reshape(4, H, w.shape[1])
        w4 = _pad_axis(_pad_axis(w4, 1, Hp), 2, k_pad)
        return w4.reshape(4 * Hp, k_pad)

    w_ih_t = pad_gate_mat(params["w_ih"], Ip).T.astype(jnp.bfloat16)   # (Ip, 4Hp)
    w_hh_t = pad_gate_mat(params["w_hh"], Hp).T.astype(jnp.bfloat16)   # (Hp, 4Hp)
    b = _pad_axis((params["b_ih"] + params["b_hh"]).reshape(4, H), 1, Hp)
    b = b.reshape(1, 4 * Hp).astype(jnp.float32)                       # (1, 4Hp)
    w_fc_t = _pad_axis(_pad_axis(params["w_fc"], 0, Op), 1, Hp).T
    w_fc_t = w_fc_t.astype(jnp.bfloat16)                               # (Hp, Op)
    b_fc = _pad_axis(params["b_fc"], 0, Op)[None, :].astype(jnp.float32)

    # ---- activation prep (time-major, padded, bf16 x stream) -----------------
    x_p = _pad_axis(_pad_axis(_pad_axis(x, 0, Bp), 1, Tp), 2, Ip)      # (Bp,Tp,Ip)
    x_tm = jnp.transpose(x_p, (1, 0, 2)).astype(jnp.bfloat16)          # (Tp,Bp,Ip)
    h0_p = _pad_axis(_pad_axis(h0, 1, Bp), 2, Hp).astype(jnp.float32)  # (1,Bp,Hp)
    c0_p = _pad_axis(_pad_axis(c0, 1, Bp), 2, Hp).astype(jnp.float32)

    # ---- phase 1: hoisted input projection (xW stored as bf16) ---------------
    xw = pl.pallas_call(
        _input_proj_kernel,
        out_shape=jax.ShapeDtypeStruct((Tp, Bp, 4 * Hp), jnp.bfloat16),
        grid_spec=pltpu.PrefetchScalarGridSpec(
            num_scalar_prefetch=0,
            grid=(nT,),
            in_specs=[
                pl.BlockSpec((Tb, Bp, Ip), lambda i: (i, 0, 0)),   # x tile
                pl.BlockSpec((Ip, 4 * Hp), lambda i: (0, 0)),      # W_ih^T
                pl.BlockSpec((1, 4 * Hp), lambda i: (0, 0)),       # fused bias
            ],
            out_specs=pl.BlockSpec((Tb, Bp, 4 * Hp), lambda i: (i, 0, 0)),
        ),
        compiler_params=pltpu.CompilerParams(
            dimension_semantics=("parallel",),
            vmem_limit_bytes=vmem_budget,
        ),
    )(x_tm, w_ih_t, b)

    # ---- phase 2: recurrence + fc head ---------------------------------------
    kernel = functools.partial(
        _lstm_kernel, hidden_p=Hp, t_block=Tb, t_total=T,
        mask_tail=mask_tail, unroll=min(8, Tb))
    fc_out, h_n_p, c_n_p = pl.pallas_call(
        kernel,
        out_shape=(
            jax.ShapeDtypeStruct((Tp, Bp, Op), jnp.float32),
            jax.ShapeDtypeStruct((1, Bp, Hp), jnp.float32),
            jax.ShapeDtypeStruct((1, Bp, Hp), jnp.float32),
        ),
        grid_spec=pltpu.PrefetchScalarGridSpec(
            num_scalar_prefetch=0,
            # time MUST stay the innermost ("arbitrary") axis: h/c carry
            # across it in VMEM scratch, re-initialized at t == 0.
            grid=(nB, nT),
            in_specs=[
                pl.BlockSpec((Tb, Bt, 4 * Hp), lambda bb, tt: (tt, bb, 0)),  # xW
                pl.BlockSpec((1, Bt, Hp), lambda bb, tt: (0, bb, 0)),        # h0
                pl.BlockSpec((1, Bt, Hp), lambda bb, tt: (0, bb, 0)),        # c0
                pl.BlockSpec((Hp, 4 * Hp), lambda bb, tt: (0, 0)),           # W_hh^T
                pl.BlockSpec((Hp, Op), lambda bb, tt: (0, 0)),               # W_fc^T
                pl.BlockSpec((1, Op), lambda bb, tt: (0, 0)),                # b_fc
            ],
            out_specs=[
                pl.BlockSpec((Tb, Bt, Op), lambda bb, tt: (tt, bb, 0)),      # fc
                pl.BlockSpec((1, Bt, Hp), lambda bb, tt: (0, bb, 0)),        # h_n
                pl.BlockSpec((1, Bt, Hp), lambda bb, tt: (0, bb, 0)),        # c_n
            ],
            scratch_shapes=[
                pltpu.VMEM((Bt, Hp), jnp.float32),
                pltpu.VMEM((Bt, Hp), jnp.float32),
                pltpu.VMEM((Tb, Bt, Hp), jnp.float32),
            ],
        ),
        compiler_params=pltpu.CompilerParams(
            dimension_semantics=("parallel", "arbitrary"),
            vmem_limit_bytes=vmem_budget,
        ),
    )(xw, h0_p, c0_p, w_hh_t, w_fc_t, b_fc)

    # strip padding; (T, B, O) -> (B, T, O) -> (B*T, O) matches
    # out.contiguous().view(-1, hidden_size) followed by fc in the module.
    out = jnp.transpose(fc_out[:T, :B, :O], (1, 0, 2)).reshape(B * T, O)
    h_n = h_n_p[:, :B, :H]
    c_n = c_n_p[:, :B, :H]
    return out, (h_n, c_n)


# ----------------------------------------------------------------------------
# Pure-JAX reference (for a light correctness sanity check).
# ----------------------------------------------------------------------------
def charrnn_reference(x, hidden, params):
    h0, c0 = hidden
    B, T, I = x.shape
    H = params["w_hh"].shape[1]
    w_ih, w_hh = params["w_ih"], params["w_hh"]
    b = params["b_ih"] + params["b_hh"]

    def step(carry, x_t):
        h, c = carry
        gates = x_t @ w_ih.T + h @ w_hh.T + b
        i = jax.nn.sigmoid(gates[:, 0 * H:1 * H])
        f = jax.nn.sigmoid(gates[:, 1 * H:2 * H])
        g = jnp.tanh(gates[:, 2 * H:3 * H])
        o = jax.nn.sigmoid(gates[:, 3 * H:4 * H])
        c = f * c + i * g
        h = o * jnp.tanh(c)
        return (h, c), h

    (h_n, c_n), hs = lax.scan(step, (h0[0], c0[0]), jnp.transpose(x, (1, 0, 2)))
    out = jnp.transpose(hs, (1, 0, 2)).reshape(B * T, H)
    out = out @ params["w_fc"].T + params["b_fc"]
    return out, (h_n[None], c_n[None])


# ----------------------------------------------------------------------------
# Deterministic parameter init (PyTorch-style U(-1/sqrt(H), 1/sqrt(H))).
# ----------------------------------------------------------------------------
def init_params(key, input_size, output_size, hidden_size):
    H = hidden_size
    k = 1.0 / jnp.sqrt(jnp.array(H, jnp.float32))
    keys = jax.random.split(key, 6)
    u = lambda kk, shape: jax.random.uniform(kk, shape, jnp.float32, -k, k)
    return {
        "w_ih": u(keys[0], (4 * H, input_size)),
        "w_hh": u(keys[1], (4 * H, H)),
        "b_ih": u(keys[2], (4 * H,)),
        "b_hh": u(keys[3], (4 * H,)),
        "w_fc": u(keys[4], (output_size, H)),
        "b_fc": u(keys[5], (output_size,)),
    }


if __name__ == "__main__":
    # Small shapes consistent with the module's forward.
    B, T, I, H, O = 2, 8, 4, 32, 4

    key = jax.random.PRNGKey(0)
    k_param, k_x, k_h, k_c = jax.random.split(key, 4)
    params = init_params(k_param, input_size=I, output_size=O, hidden_size=H)

    x = jax.random.normal(k_x, (B, T, I), dtype=jnp.float32)
    # non-zero hidden to exercise the h0/c0 path (init_hidden would give zeros)
    hidden = (0.5 * jax.random.normal(k_h, (1, B, H), jnp.float32),
              0.5 * jax.random.normal(k_c, (1, B, H), jnp.float32))

    out, (h_n, c_n) = charrnn_forward(x, hidden, params)
    out = jax.block_until_ready(out)
    h_n = jax.block_until_ready(h_n)
    c_n = jax.block_until_ready(c_n)

    # sanity check against pure-JAX f32 reference; tolerance is bf16-operand
    # level (MXU operands and the xW stream are bf16, accumulation is f32).
    out_ref, (h_ref, c_ref) = charrnn_reference(x, hidden, params)
    assert out.shape == (B * T, O)
    assert h_n.shape == (1, B, H) and c_n.shape == (1, B, H)
    assert jnp.allclose(out, out_ref, atol=2e-2, rtol=2e-2)
    assert jnp.allclose(h_n, h_ref, atol=2e-2, rtol=2e-2)
    assert jnp.allclose(c_n, c_ref, atol=2e-2, rtol=2e-2)

    print("KERNEL_OK")
</pallas_src>

<mosaic_0001>
module attributes {stable_mosaic.version = 11 : i64} {
  func.func @_input_proj_kernel(%arg0: i32, %arg1: memref<8x8x128xbf16, #tpu.memory_space<vmem>>, %arg2: memref<128x512xbf16, #tpu.memory_space<vmem>>, %arg3: memref<1x512xf32, #tpu.memory_space<vmem>>, %arg4: memref<8x8x512xbf16, #tpu.memory_space<vmem>>) attributes {dimension_semantics = [#tpu.dimension_semantics<parallel>], iteration_bounds = array<i64: 1>, scalar_prefetch = 0 : i64, scratch_operands = 0 : i64, tpu.core_type = #tpu.core_type<tc>, window_params = [{transform_indices = @transform_0, window_bounds = array<i64: 8, 8, 128>}, {pipeline_mode = #tpu.pipeline_mode<synchronous>, transform_indices = @transform_1, window_bounds = array<i64: 128, 512>}, {pipeline_mode = #tpu.pipeline_mode<synchronous>, transform_indices = @transform_2, window_bounds = array<i64: 1, 512>}, {transform_indices = @transform_3, window_bounds = array<i64: 8, 8, 512>}]} {
    %c0 = arith.constant 0 : index
    %c0_0 = arith.constant 0 : index
    %c0_1 = arith.constant 0 : index
    %0 = vector.load %arg1[%c0, %c0_0, %c0_1] : memref<8x8x128xbf16, #tpu.memory_space<vmem>>, vector<8x8x128xbf16>
    %1 = vector.shape_cast %0 : vector<8x8x128xbf16> to vector<64x128xbf16>
    %c0_2 = arith.constant 0 : index
    %c0_3 = arith.constant 0 : index
    %2 = vector.load %arg2[%c0_2, %c0_3] : memref<128x512xbf16, #tpu.memory_space<vmem>>, vector<128x512xbf16>
    %cst = arith.constant dense<0.000000e+00> : vector<64x512xf32>
    %3 = tpu.matmul %1, %2, %cst {dimension_numbers = #tpu.dot_dimension_numbers<[1], [0], [0], [1], [0, 0, 1, 1], [], []>} : vector<64x128xbf16>, vector<128x512xbf16>, vector<64x512xf32> -> vector<64x512xf32>
    %c0_4 = arith.constant 0 : index
    %c0_5 = arith.constant 0 : index
    %4 = vector.load %arg3[%c0_4, %c0_5] : memref<1x512xf32, #tpu.memory_space<vmem>>, vector<1x512xf32>
    %5 = vector.broadcast %4 : vector<1x512xf32> to vector<64x512xf32>
    %6 = arith.addf %3, %5 : vector<64x512xf32>
    %7 = vector.shape_cast %6 : vector<64x512xf32> to vector<8x8x512xf32>
    %8 = arith.truncf %7 : vector<8x8x512xf32> to vector<8x8x512xbf16>
    %c0_6 = arith.constant 0 : index
    %c0_7 = arith.constant 0 : index
    %c0_8 = arith.constant 0 : index
    %9 = vector.load %arg4[%c0_6, %c0_7, %c0_8] : memref<8x8x512xbf16, #tpu.memory_space<vmem>>, vector<8x8x512xbf16>
    tpu.vector_store %arg4[%c0_6, %c0_7, %c0_8], %8 {strides = array<i32>} : memref<8x8x512xbf16, #tpu.memory_space<vmem>>, vector<8x8x512xbf16>,
    return
  }
  func.func @transform_0(%arg0: i32) -> (i32, i32, i32) {
    %c0_i32 = arith.constant 0 : i32
    %c0_i32_0 = arith.constant 0 : i32
    %c0_i32_1 = arith.constant 0 : i32
    return %arg0, %c0_i32, %c0_i32_0 : i32, i32, i32
  }
  func.func @transform_1(%arg0: i32) -> (i32, i32) {
    %c0_i32 = arith.constant 0 : i32
    %c0_i32_0 = arith.constant 0 : i32
    %c0_i32_1 = arith.constant 0 : i32
    return %c0_i32, %c0_i32_0 : i32, i32
  }
  func.func @transform_2(%arg0: i32) -> (i32, i32) {
    %c0_i32 = arith.constant 0 : i32
    %c0_i32_0 = arith.constant 0 : i32
    %c0_i32_1 = arith.constant 0 : i32
    return %c0_i32, %c0_i32_0 : i32, i32
  }
  func.func @transform_3(%arg0: i32) -> (i32, i32, i32) {
    %c0_i32 = arith.constant 0 : i32
    %c0_i32_0 = arith.constant 0 : i32
    %c0_i32_1 = arith.constant 0 : i32
    return %arg0, %c0_i32, %c0_i32_0 : i32, i32, i32
  }
}

</mosaic_0001>

<bundles_post_ra>
// kernel: tpu_custom_call.1
= control target key start
LH: loop header
LB: loop body
LE: loop exit
PB: predicated region body
PF: predicated region fallthrough
CT: control target
= control target key end

     0   :  { %8 = vsyncpa [#allocation3], 0  ;;  %s919_s0 = inlined_call_operand.hbm [shape: bf16[8,8,128], index: 0, kind: input, shape index: {}]   ;;  %s920_s1 = inlined_call_operand.hbm [shape: bf16[128,512], index: 1, kind: input, shape index: {}]   ;;  %s921_s2 = inlined_call_operand.vmem [shape: f32[1,512], index: 2, kind: input, shape index: {}]   ;;  %s922_s3 = inlined_call_operand.hbm [shape: bf16[8,8,512], index: 3, kind: output, shape index: {}]  }
   0x1   :  { %9 = vsyncpa [#allocation6], 0 }
   0x2   :  { %10 = vsyncpa [#allocation4], 0  ;;  %s798_s12 = smov [#allocation2]   ;;  %s726_s16 = scalar_lea.hbm %s919_s0, 512 }
   0x3   :  { %s16_s13 = sshll.u32 %s798_s12, 4  ;;  %p727_p0 = scmp.ne.s32.totalorder %s919_s0, %s726_s16  ;;  %s17_s13 = int_to_ptr.vmem [resolvable:$true] %s16_s13 }
   0x4   :  { %p730_p1 = scmp.lt.u32.totalorder %s726_s16, %s919_s0 }
   0x6   :  { %p732_p2 = pnand %p730_p1, %p727_p0 }
   0x8   :  { %735 = shalt.err (!%p732_p2)
}
   0x9   :  { %s736_s21 = scalar_lea.vmem %s17_s13, 512  ;;  %p741_p4 = scmp.lt.s32.totalorder %s17_s13, %s17_s13 }
   0xa   :  { %p737_p3 = scmp.ne.s32.totalorder %s17_s13, %s736_s21  ;;  %p742_p5 = scmp.lt.s32.totalorder %s736_s21, %s736_s21 }
   0xc   :  { %p743_p6 = por %p742_p5, %p741_p4 }
   0xe   :  { %p744_p7 = pnand %p743_p6, %p737_p3 }
  0x10   :  { %747 = shalt.err (!%p744_p7)
}
  0x11   :  { %s799_s22 = smov 64   ;;  %s800_s23 = smov 4  }
  0x12   :  { %22 = dma.hbm_to_vmem [thread:$0]  %s919_s0, 512, %s17_s13, [#allocation3], %s799_s22, %s799_s22, %s800_s23  }
  0x13   :  { %s801_s26 = smov [#allocation5]   ;;  %s748_s30 = scalar_lea.hbm %s920_s1, 4096 }
  0x14   :  { %s28_s27 = sshll.u32 %s801_s26, 4  ;;  %p749_p8 = scmp.ne.s32.totalorder %s920_s1, %s748_s30  ;;  %s29_s27 = int_to_ptr.vmem [resolvable:$true] %s28_s27 }
  0x15   :  { %p752_p9 = scmp.lt.u32.totalorder %s748_s30, %s920_s1 }
  0x17   :  { %p754_p10 = pnand %p752_p9, %p749_p8 }
  0x19   :  { %757 = shalt.err (!%p754_p10)
}
  0x1a   :  { %s758_s8 = scalar_lea.vmem %s29_s27, 4096  ;;  %p763_p12 = scmp.lt.s32.totalorder %s29_s27, %s29_s27 }
  0x1b   :  { %p759_p11 = scmp.ne.s32.totalorder %s29_s27, %s758_s8  ;;  %p764_p13 = scmp.lt.s32.totalorder %s758_s8, %s758_s8 }
  0x1d   :  { %p765_p0 = por %p764_p13, %p763_p12 }
  0x1f   :  { %p766_p1 = pnand %p765_p0, %p759_p11 }
  0x21   :  { %769 = shalt.err (!%p766_p1)
}
  0x22   :  { %s802_s0 = smov 256   ;;  %s803_s9 = smov 16  }
  0x23   :  { %34 = dma.hbm_to_vmem [thread:$0]  %s920_s1, 4096, %s29_s27, [#allocation6], %s802_s0, %s802_s0, %s803_s9  }
  0x24   :  { %792 = dma.done.wait [#allocation3], 512  }
  0x25   :  { %793 = vsyncadd [#allocation3], 4294966784 }
  0x26   :  { %794 = dma.done.wait [#allocation6], 4096  }
  0x27   :  { %795 = vsyncadd [#allocation6], 4294963200  ;;  %v804_v0 = vmov 0   ;;  %v674_v1 = vld [vmem:[#allocation5 + $0x4] ss:$16 sps:$4 sm:$0xff]   ;;  %v723_v34 = vld [vmem:[#allocation2 + $0x8] sm:$0xff]   ;;  %v86_v37 = vlaneseq }
  0x28   :  { %322 = vmatprep.mubr.bf16.mxu0 %v804_v0  ;;  %395 = vmatprep.mubr.bf16.mxu1 %v804_v0  ;;  %v676_v2 = vld [vmem:[#allocation5 + $0xc] ss:$16 sps:$4 sm:$0xff]   ;;  %v678_v3 = vld [vmem:[#allocation5] ss:$16 sps:$4 sm:$0xff]   ;;  %v679_v4 = vld [vmem:[#allocation5 + $0x8] ss:$16 sps:$4 sm:$0xff]  }
  0x29   :  { %290 = vmatprep.subr.bf16.mxu0 %v674_v1  ;;  %363 = vmatprep.subr.bf16.mxu1 %v676_v2  ;;  %v680_v5 = vld [vmem:[#allocation5 + $0x24] ss:$16 sps:$4 sm:$0xff]   ;;  %v682_v6 = vld [vmem:[#allocation5 + $0x2c] ss:$16 sps:$4 sm:$0xff]   ;;  %v684_v7 = vld [vmem:[#allocation5 + $0x20] ss:$16 sps:$4 sm:$0xff]  }
  0x2a   :  { %291 = vmatpush1.bf16.msra.mxu0 %v678_v3  ;;  %364 = vmatpush1.bf16.msra.mxu1 %v679_v4  ;;  %v685_v8 = vld [vmem:[#allocation5 + $0x28] ss:$16 sps:$4 sm:$0xff]   ;;  %v686_v9 = vld [vmem:[#allocation5 + $0x44] ss:$16 sps:$4 sm:$0xff]   ;;  %v688_v10 = vld [vmem:[#allocation5 + $0x4c] ss:$16 sps:$4 sm:$0xff]  }
  0x2b   :  { %292 = vmatprep.subr.bf16.mxu0 %v680_v5  ;;  %365 = vmatprep.subr.bf16.mxu1 %v682_v6  ;;  %v690_v11 = vld [vmem:[#allocation5 + $0x40] ss:$16 sps:$4 sm:$0xff]   ;;  %v691_v12 = vld [vmem:[#allocation5 + $0x48] ss:$16 sps:$4 sm:$0xff]   ;;  %v692_v13 = vld [vmem:[#allocation5 + $0x64] ss:$16 sps:$4 sm:$0xff]  }
  0x2c   :  { %v694_v14 = vld [vmem:[#allocation5 + $0x6c] ss:$16 sps:$4 sm:$0xff]   ;;  %v696_v15 = vld [vmem:[#allocation5 + $0x60] ss:$16 sps:$4 sm:$0xff]   ;;  %v697_v16 = vld [vmem:[#allocation5 + $0x68] ss:$16 sps:$4 sm:$0xff]  }
  0x2d   :  { %v698_v17 = vld [vmem:[#allocation5 + $0x84] ss:$16 sps:$4 sm:$0xff]   ;;  %v700_v18 = vld [vmem:[#allocation5 + $0x8c] ss:$16 sps:$4 sm:$0xff]   ;;  %v702_v19 = vld [vmem:[#allocation5 + $0x80] ss:$16 sps:$4 sm:$0xff]  }
  0x2e   :  { %293 = vmatpush1.bf16.msra.mxu0 %v684_v7  ;;  %366 = vmatpush1.bf16.msra.mxu1 %v685_v8  ;;  %v703_v20 = vld [vmem:[#allocation5 + $0x88] ss:$16 sps:$4 sm:$0xff]   ;;  %v704_v21 = vld [vmem:[#allocation5 + $0xa4] ss:$16 sps:$4 sm:$0xff]   ;;  %v706_v22 = vld [vmem:[#allocation5 + $0xac] ss:$16 sps:$4 sm:$0xff]  }
  0x2f   :  { %294 = vmatprep.subr.bf16.mxu0 %v686_v9  ;;  %367 = vmatprep.subr.bf16.mxu1 %v688_v10  ;;  %v708_v23 = vld [vmem:[#allocation5 + $0xa0] ss:$16 sps:$4 sm:$0xff]   ;;  %v709_v24 = vld [vmem:[#allocation5 + $0xa8] ss:$16 sps:$4 sm:$0xff]   ;;  %v710_v25 = vld [vmem:[#allocation5 + $0xc4] ss:$16 sps:$4 sm:$0xff]  }
  0x30   :  { %v712_v26 = vld [vmem:[#allocation5 + $0xcc] ss:$16 sps:$4 sm:$0xff]   ;;  %v714_v27 = vld [vmem:[#allocation5 + $0xc0] ss:$16 sps:$4 sm:$0xff]   ;;  %v715_v28 = vld [vmem:[#allocation5 + $0xc8] ss:$16 sps:$4 sm:$0xff]  }
  0x31   :  { %v716_v29 = vld [vmem:[#allocation5 + $0xe4] ss:$16 sps:$4 sm:$0xff]   ;;  %v718_v30 = vld [vmem:[#allocation5 + $0xec] ss:$16 sps:$4 sm:$0xff]   ;;  %v720_v31 = vld [vmem:[#allocation5 + $0xe0] ss:$16 sps:$4 sm:$0xff]  }
  0x32   :  { %295 = vmatpush1.bf16.msra.mxu0 %v690_v11  ;;  %368 = vmatpush1.bf16.msra.mxu1 %v691_v12  ;;  %v721_v32 = vld [vmem:[#allocation5 + $0xe8] ss:$16 sps:$4 sm:$0xff]   ;;  %v722_v33 = vld [vmem:[#allocation2] sm:$0xff]   ;;  %v724_v35 = vld [vmem:[#allocation2 + $0x10] sm:$0xff]   ;;  %v87_v38 = vshrl.u32 %v86_v37, 7 }
  0x33   :  { %296 = vmatprep.subr.bf16.mxu0 %v692_v13  ;;  %369 = vmatprep.subr.bf16.mxu1 %v694_v14  ;;  %v725_v36 = vld [vmem:[#allocation2 + $0x18] sm:$0xff]   ;;  %v84_v41 = vld [vmem:[%s921_s2] sm:$0xf]  ;;  %s805_s2 = smov [#allocation7]  }
  0x34   :  { %v88_v39 = vsub.s32 0, %v87_v38  ;;  %v96_v40 = vsub.s32 2, %v87_v38  ;;  %v92_v42 = vsub.s32 1, %v87_v38  ;;  %v100_v43 = vsub.s32 3, %v87_v38  ;;  %s585_s13 = sshll.u32 %s805_s2, 4  ;;  %s586_s13 = int_to_ptr.vmem [resolvable:$true] %s585_s13 }
  0x35   :  { %s770_s14 = scalar_lea.vmem %s586_s13, 2048  ;;  %p775_p3 = scmp.lt.s32.totalorder %s586_s13, %s586_s13 }
  0x36   :  { %297 = vmatpush1.bf16.msra.mxu0 %v696_v15  ;;  %370 = vmatpush1.bf16.msra.mxu1 %v697_v16  ;;  %v864_v44 = vrot.slane %v84_v41, %v88_v39  ;;  %v866_v45 = vrot.slane %v84_v41, %v96_v40  ;;  %v868_v46 = vrot.slane %v84_v41, %v92_v42  ;;  %p771_p2 = scmp.ne.s32.totalorder %s586_s13, %s770_s14  ;;  %p776_p4 = scmp.lt.s32.totalorder %s770_s14, %s770_s14 }
  0x37   :  { %298 = vmatprep.subr.bf16.mxu0 %v698_v17  ;;  %371 = vmatprep.subr.bf16.mxu1 %v700_v18  ;;  %v870_v47 = vrot.slane %v84_v41, %v100_v43 }
  0x38   :  { %p777_p5 = por %p776_p4, %p775_p3 }
  0x3a   :  { %299 = vmatpush1.bf16.msra.mxu0 %v702_v19  ;;  %372 = vmatpush1.bf16.msra.mxu1 %v703_v20  ;;  %p778_p6 = pnand %p777_p5, %p771_p2 }
  0x3b   :  { %300 = vmatprep.subr.bf16.mxu0 %v704_v21  ;;  %373 = vmatprep.subr.bf16.mxu1 %v706_v22 }
  0x3e   :  { %301 = vmatpush1.bf16.msra.mxu0 %v708_v23  ;;  %374 = vmatpush1.bf16.msra.mxu1 %v709_v24 }
  0x3f   :  { %302 = vmatprep.subr.bf16.mxu0 %v710_v25  ;;  %375 = vmatprep.subr.bf16.mxu1 %v712_v26 }
  0x42   :  { %303 = vmatpush1.bf16.msra.mxu0 %v714_v27  ;;  %376 = vmatpush1.bf16.msra.mxu1 %v715_v28 }
  0x43   :  { %304 = vmatprep.subr.bf16.mxu0 %v716_v29  ;;  %377 = vmatprep.subr.bf16.mxu1 %v718_v30 }
  0x46   :  { %305 = vmatpush1.bf16.msra.mxu0 %v720_v31  ;;  %378 = vmatpush1.bf16.msra.mxu1 %v721_v32 }
  0x49   :  { %323 = vmatmul.mubr.bf16.vlgmr.msra.gmra.mrb[0].mxu0 %v722_v33  ;;  %396 = vmatmul.mubr.bf16.vlgmr.msra.gmra.mrb[0].mxu1 %v722_v33 }
  0x4a   :  { %332 = vmatprep.mubr.bf16.mxu0 %v804_v0  ;;  %405 = vmatprep.mubr.bf16.mxu1 %v804_v0 }
  0x51   :  { %333 = vmatmul.mubr.bf16.gmra.mrb[4].mxu0 %v723_v34  ;;  %406 = vmatmul.mubr.bf16.gmra.mrb[4].mxu1 %v723_v34 }
  0x52   :  { %342 = vmatprep.mubr.bf16.mxu0 %v804_v0  ;;  %415 = vmatprep.mubr.bf16.mxu1 %v804_v0 }
  0x59   :  { %343 = vmatmul.mubr.bf16.gmra.mrb[8].mxu0 %v724_v35  ;;  %416 = vmatmul.mubr.bf16.gmra.mrb[8].mxu1 %v724_v35 }
  0x5a   :  { %352 = vmatprep.mubr.bf16.mxu0 %v804_v0  ;;  %425 = vmatprep.mubr.bf16.mxu1 %v804_v0 }
  0x61   :  { %353 = vmatmul.mubr.bf16.gmra.mrb[12].mxu0 %v725_v36  ;;  %426 = vmatmul.mubr.bf16.gmra.mrb[12].mxu1 %v725_v36 }
 0x11c   :  { %v324_v48 = vpop.f32.mrb[0].mxu0  ;;  %v397_v49 = vpop.f32.mrb[0].mxu1 }
 0x11d   :  { %v325_v50 = vadd.f32 %v324_v48, %v864_v44  ;;  %v398_v51 = vadd.f32 %v397_v49, %v866_v45  ;;  %v326_v52 = vpop.f32.mrb[1].mxu0  ;;  %v399_v53 = vpop.f32.mrb[1].mxu1 }
 0x11e   :  { %v327_v54 = vadd.f32 %v326_v52, %v868_v46  ;;  %v400_v55 = vadd.f32 %v399_v53, %v870_v47  ;;  %v328_v56 = vpop.f32.mrb[2].mxu0  ;;  %v401_v57 = vpop.f32.mrb[2].mxu1 }
 0x11f   :  { %v329_v58 = vadd.f32 %v328_v56, %v864_v44  ;;  %v402_v59 = vadd.f32 %v401_v57, %v866_v45  ;;  %v330_v60 = vpop.f32.mrb[3].mxu0  ;;  %v403_v61 = vpop.f32.mrb[3].mxu1 }
 0x120   :  { %v650_v62 = vpack.c.bf16 %v327_v54, %v325_v50  ;;  %v651_v63 = vpack.c.bf16 %v400_v55, %v398_v51  ;;  %v331_v0 = vadd.f32 %v330_v60, %v868_v46  ;;  %v404_v1 = vadd.f32 %v403_v61, %v870_v47 }
 0x122   :  { %564 = vst [vmem:[#allocation7] sm:$0xff] %v650_v62  ;;  %565 = vst [vmem:[#allocation7 + $0x8] sm:$0xff] %v651_v63  ;;  %v652_v2 = vpack.c.bf16 %v331_v0, %v329_v58  ;;  %v653_v3 = vpack.c.bf16 %v404_v1, %v402_v59 }
 0x124   :  { %566 = vst [vmem:[#allocation7 + $0x10] sm:$0xff] %v652_v2  ;;  %567 = vst [vmem:[#allocation7 + $0x18] sm:$0xff] %v653_v3  ;;  %v334_v4 = vpop.f32.mrb[4].mxu0  ;;  %v407_v5 = vpop.f32.mrb[4].mxu1 }
 0x125   :  { %v335_v6 = vadd.f32 %v334_v4, %v864_v44  ;;  %v408_v7 = vadd.f32 %v407_v5, %v866_v45  ;;  %v336_v8 = vpop.f32.mrb[5].mxu0  ;;  %v409_v9 = vpop.f32.mrb[5].mxu1 }
 0x126   :  { %v337_v10 = vadd.f32 %v336_v8, %v868_v46  ;;  %v410_v11 = vadd.f32 %v409_v9, %v870_v47  ;;  %v338_v12 = vpop.f32.mrb[6].mxu0  ;;  %v411_v13 = vpop.f32.mrb[6].mxu1 }
 0x127   :  { %v339_v14 = vadd.f32 %v338_v12, %v864_v44  ;;  %v412_v15 = vadd.f32 %v411_v13, %v866_v45  ;;  %v340_v16 = vpop.f32.mrb[7].mxu0  ;;  %v413_v17 = vpop.f32.mrb[7].mxu1 }
 0x128   :  { %v654_v18 = vpack.c.bf16 %v337_v10, %v335_v6  ;;  %v655_v19 = vpack.c.bf16 %v410_v11, %v408_v7  ;;  %v341_v20 = vadd.f32 %v340_v16, %v868_v46  ;;  %v414_v21 = vadd.f32 %v413_v17, %v870_v47 }
 0x12a   :  { %568 = vst [vmem:[#allocation7 + $0x20] sm:$0xff] %v654_v18  ;;  %569 = vst [vmem:[#allocation7 + $0x28] sm:$0xff] %v655_v19  ;;  %v656_v22 = vpack.c.bf16 %v341_v20, %v339_v14  ;;  %v657_v23 = vpack.c.bf16 %v414_v21, %v412_v15 }
 0x12c   :  { %570 = vst [vmem:[#allocation7 + $0x30] sm:$0xff] %v656_v22  ;;  %571 = vst [vmem:[#allocation7 + $0x38] sm:$0xff] %v657_v23  ;;  %v344_v24 = vpop.f32.mrb[8].mxu0  ;;  %v417_v25 = vpop.f32.mrb[8].mxu1 }
 0x12d   :  { %v345_v26 = vadd.f32 %v344_v24, %v864_v44  ;;  %v418_v27 = vadd.f32 %v417_v25, %v866_v45  ;;  %v346_v28 = vpop.f32.mrb[9].mxu0  ;;  %v419_v29 = vpop.f32.mrb[9].mxu1 }
 0x12e   :  { %v347_v30 = vadd.f32 %v346_v28, %v868_v46  ;;  %v420_v31 = vadd.f32 %v419_v29, %v870_v47  ;;  %v348_v32 = vpop.f32.mrb[10].mxu0  ;;  %v421_v33 = vpop.f32.mrb[10].mxu1 }
 0x12f   :  { %v349_v34 = vadd.f32 %v348_v32, %v864_v44  ;;  %v422_v35 = vadd.f32 %v421_v33, %v866_v45  ;;  %v350_v36 = vpop.f32.mrb[11].mxu0  ;;  %v423_v37 = vpop.f32.mrb[11].mxu1 }
 0x130   :  { %v658_v38 = vpack.c.bf16 %v347_v30, %v345_v26  ;;  %v659_v39 = vpack.c.bf16 %v420_v31, %v418_v27  ;;  %v351_v40 = vadd.f32 %v350_v36, %v868_v46  ;;  %v424_v41 = vadd.f32 %v423_v37, %v870_v47 }
 0x132   :  { %572 = vst [vmem:[#allocation7 + $0x40] sm:$0xff] %v658_v38  ;;  %573 = vst [vmem:[#allocation7 + $0x48] sm:$0xff] %v659_v39  ;;  %v660_v42 = vpack.c.bf16 %v351_v40, %v349_v34  ;;  %v661_v43 = vpack.c.bf16 %v424_v41, %v422_v35 }
 0x134   :  { %574 = vst [vmem:[#allocation7 + $0x50] sm:$0xff] %v660_v42  ;;  %575 = vst [vmem:[#allocation7 + $0x58] sm:$0xff] %v661_v43  ;;  %v354_v48 = vpop.f32.mrb[12].mxu0  ;;  %v427_v49 = vpop.f32.mrb[12].mxu1 }
 0x135   :  { %v355_v50 = vadd.f32 %v354_v48, %v864_v44  ;;  %v428_v51 = vadd.f32 %v427_v49, %v866_v45  ;;  %v356_v52 = vpop.f32.mrb[13].mxu0  ;;  %v429_v53 = vpop.f32.mrb[13].mxu1 }
 0x136   :  { %v357_v54 = vadd.f32 %v356_v52, %v868_v46  ;;  %v430_v55 = vadd.f32 %v429_v53, %v870_v47  ;;  %v358_v56 = vpop.f32.mrb[14].mxu0  ;;  %v431_v57 = vpop.f32.mrb[14].mxu1 }
 0x137   :  { %v359_v58 = vadd.f32 %v358_v56, %v864_v44  ;;  %v432_v59 = vadd.f32 %v431_v57, %v866_v45  ;;  %v360_v60 = vpop.f32.mrb[15].mxu0  ;;  %v433_v61 = vpop.f32.mrb[15].mxu1 }
 0x138   :  { %v662_v62 = vpack.c.bf16 %v357_v54, %v355_v50  ;;  %v663_v63 = vpack.c.bf16 %v430_v55, %v428_v51  ;;  %v361_v0 = vadd.f32 %v360_v60, %v868_v46  ;;  %v434_v1 = vadd.f32 %v433_v61, %v870_v47 }
 0x13a   :  { %576 = vst [vmem:[#allocation7 + $0x60] sm:$0xff] %v662_v62  ;;  %577 = vst [vmem:[#allocation7 + $0x68] sm:$0xff] %v663_v63  ;;  %v664_v2 = vpack.c.bf16 %v361_v0, %v359_v58  ;;  %v665_v3 = vpack.c.bf16 %v434_v1, %v432_v59 }
 0x13c   :  { %578 = vst [vmem:[#allocation7 + $0x70] sm:$0xff] %v664_v2  ;;  %579 = vst [vmem:[#allocation7 + $0x78] sm:$0xff] %v665_v3 }
 0x13d   :  { %781 = shalt.err (!%p778_p6)
}
 0x13e   :  { %s782_s17 = scalar_lea.hbm %s922_s3, 2048 }
 0x13f   :  { %p783_p7 = scmp.ne.s32.totalorder %s922_s3, %s782_s17  ;;  %p786_p8 = scmp.lt.u32.totalorder %s782_s17, %s922_s3 }
 0x141   :  { %p788_p9 = pnand %p786_p8, %p783_p7 }
 0x143   :  { %791 = shalt.err (!%p788_p9)
}
 0x144   :  { %591 = dma.vmem_to_hbm [thread:$0]  %s586_s13, 2048, %s922_s3, [#allocation4], %s802_s0, %s802_s0, %s803_s9  }
 0x145   :  { %796 = dma.done.wait [#allocation4], 2048  }
 0x146   :  { %797 = vsyncadd [#allocation4], 4294965248 }
 0x147   :  { %595 = vsyncpa [#allocation3], 1 }
 0x148   :  { %596 = vsyncpa [#allocation6], 1 }
 0x149   :  { %597 = vsyncpa [#allocation4], 1 }

</bundles_post_ra>
